<compile_context>
chip_gen: v6e
topology: v6e:2x2x1
jax: 0.10.0
libtpu: 0.0.40
codegen_flags: <defaults>
</compile_context>

<pallas_src>
import jax
import jax.numpy as jnp
from jax import lax
from jax.experimental import pallas as pl
from jax.experimental.pallas import tpu as pltpu


def _pool_selectors(L, B, pad):
    """0/1 matrices of shape (L*B, (L//2 + 2*pad)*B).

    Right-multiplying the (C, L*B) conv output (column = l*B + b) by these selects the
    even / odd member of each pooling pair per batch element and places the result into
    a slab that is already zero-padded by `pad` positions on each side for the next
    layer's SAME convolution.  Each column has at most a single 1, so the pooling
    max(y @ Se, y @ So) is exact.
    """
    Lh = L // 2
    r = jnp.arange(L * B)
    c = jnp.arange((Lh + 2 * pad) * B)
    l_r, b_r = r // B, r % B
    m_c, b_c = c // B, c % B
    valid = (m_c >= pad) & (m_c < Lh + pad)
    tgt = 2 * (m_c - pad)
    same_b = b_r[:, None] == b_c[None, :]
    se = (same_b & valid[None, :] & (l_r[:, None] == tgt[None, :])).astype(jnp.float32)
    so = (same_b & valid[None, :] & (l_r[:, None] == (tgt + 1)[None, :])).astype(jnp.float32)
    return se, so


def _make_kernel(B, L0, K, num_layers):
    """Fully fused forward pass: all refs live in VMEM, no grid."""

    def kernel(*refs):
        x_ref = refs[0]
        conv_refs = refs[1:1 + 4 * num_layers]
        w1_ref, b1_ref, w2_ref, b2_ref, o_ref = refs[1 + 4 * num_layers:]

        a = x_ref[...]                       # (Cin, (L + 2*pad)*B), column = pos*B + b
        L = L0
        for i in range(num_layers):
            w_ref, b_ref, se_ref, so_ref = conv_refs[4 * i: 4 * i + 4]
            # im2col: stack the K shifted windows along sublanes -> (K*Cin, L*B).
            xcat = jnp.concatenate([a[:, k * B: k * B + L * B] for k in range(K)], axis=0)
            # Conv1d(kernel=K, SAME) as a single MXU matmul + bias + ReLU.
            y = jnp.dot(w_ref[...], xcat, preferred_element_type=jnp.float32)
            y = jnp.maximum(y + b_ref[...], 0.0)                     # (Cout, L*B)
            # MaxPool1d(2) + zero padding for the next layer via selection matmuls
            # (selectors are hoisted: built host-side, passed in as inputs).
            a = jnp.maximum(
                jnp.dot(y, se_ref[...], preferred_element_type=jnp.float32),
                jnp.dot(y, so_ref[...], preferred_element_type=jnp.float32))
            L //= 2

        # a: (C, L3*B) with column = l*B + b (last selector adds no padding).
        # Re-stack to (L3*C, B); W1 was re-packed host-side so flatten + fc1 is one matmul.
        xfc = jnp.concatenate([a[:, l * B:(l + 1) * B] for l in range(L)], axis=0)
        h = jnp.dot(w1_ref[...], xfc, preferred_element_type=jnp.float32)    # (fc, B)
        h = jnp.maximum(h + b1_ref[...], 0.0)
        o_ref[...] = (jnp.dot(w2_ref[...], h, preferred_element_type=jnp.float32)
                      + b2_ref[...])                                         # (out, B)

    return kernel


def cnn1d_forward(x, params):
    """x: (B, 1, input_size) float32; params as produced by init_params."""
    B, cin0, L0 = x.shape
    assert cin0 == 1
    num_layers = len(params["convs"])
    assert L0 % (2 ** num_layers) == 0
    cout0, _, K = params["convs"][0][0].shape
    pad = (K - 1) // 2

    # ---- host-side layout plumbing (tiny, one-time per call) ----
    # Input: (B, 1, L) -> batch-interleaved, zero-padded row (1, (L+2*pad)*B).
    xt = jnp.pad(x[:, 0, :].T, ((pad, pad), (0, 0)))          # (L+2*pad, B)
    inputs = [xt.reshape(1, (L0 + 2 * pad) * B)]

    L = L0
    for i, (w, b) in enumerate(params["convs"]):
        cout, cin, k = w.shape
        w2d = jnp.transpose(w, (0, 2, 1)).reshape(cout, k * cin)   # [co, k*Cin+ci]
        last = (i == num_layers - 1)
        se, so = _pool_selectors(L, B, 0 if last else pad)
        inputs += [w2d, b.reshape(cout, 1), se, so]
        L //= 2

    L3 = L
    C = params["convs"][-1][0].shape[0]
    fc = params["W1"].shape[1]
    nout = params["W2"].shape[1]
    # W1 re-packed so that row order matches the in-kernel (L3*C, B) restack:
    # w1cat[j, l*C + c] = W1[c*L3 + l, j]  (torch Flatten is channel-major: f = c*L3 + l).
    w1cat = jnp.transpose(params["W1"].reshape(C, L3, fc), (2, 1, 0)).reshape(fc, L3 * C)
    inputs += [w1cat, params["b1"].reshape(fc, 1),
               params["W2"].T, params["b2"].reshape(nout, 1)]

    kernel = _make_kernel(B=B, L0=L0, K=K, num_layers=num_layers)
    out_t = pl.pallas_call(
        kernel,
        out_shape=jax.ShapeDtypeStruct((nout, B), jnp.float32),
        in_specs=[pl.BlockSpec(memory_space=pltpu.MemorySpace.VMEM)] * len(inputs),
        out_specs=pl.BlockSpec(memory_space=pltpu.MemorySpace.VMEM),
    )(*inputs)
    return out_t.T                                               # (B, output_size)


def reference_forward(x, params):
    """Pure-JAX reference of the PyTorch forward pass (for correctness check)."""
    h = x
    for (w, b) in params["convs"]:
        h = lax.conv_general_dilated(
            h, w, window_strides=(1,), padding=[(2, 2)],
            dimension_numbers=("NCH", "OIH", "NCH"))
        h = jnp.maximum(h + b[None, :, None], 0.0)
        Bsz, C, L = h.shape
        h = jnp.max(h.reshape(Bsz, C, L // 2, 2), axis=-1)
    flat = h.reshape(h.shape[0], -1)
    hh = jnp.maximum(flat @ params["W1"] + params["b1"], 0.0)
    return hh @ params["W2"] + params["b2"]


def init_params(num_channels, fc_size, output_size, input_size, num_conv_layers=3):
    """Deterministic synthetic parameter init (shapes match the nn.Module)."""
    keys = iter(jax.random.split(jax.random.PRNGKey(12345), 4 * num_conv_layers + 4))

    def nrm(shape, scale):
        return (scale * jax.random.normal(next(keys), shape)).astype(jnp.float32)

    convs = []
    in_ch = 1
    for _ in range(num_conv_layers):
        w = nrm((num_channels, in_ch, 5), 1.0 / (5 * in_ch) ** 0.5)
        b = nrm((num_channels,), 0.05)
        convs.append((w, b))
        in_ch = num_channels
    out_dim = num_channels * (input_size // (2 ** num_conv_layers))
    return {
        "convs": convs,
        "W1": nrm((out_dim, fc_size), 1.0 / out_dim ** 0.5),
        "b1": nrm((fc_size,), 0.05),
        "W2": nrm((fc_size, output_size), 1.0 / fc_size ** 0.5),
        "b2": nrm((output_size,), 0.05),
    }


if __name__ == "__main__":
    num_channels, fc_size, output_size, input_size = 8, 32, 4, 64
    batch = 2

    params = init_params(num_channels, fc_size, output_size, input_size)
    x = jax.random.normal(jax.random.PRNGKey(0), (batch, 1, input_size), jnp.float32)

    fwd = jax.jit(cnn1d_forward)
    out = jax.block_until_ready(fwd(x, params))
    ref = jax.block_until_ready(reference_forward(x, params))

    assert out.shape == (batch, output_size), out.shape
    assert jnp.allclose(out, ref, atol=2e-4, rtol=2e-4), (out, ref)
    print("KERNEL_OK")
</pallas_src>

<mosaic_0001>
module attributes {stable_mosaic.version = 11 : i64} {
  func.func @kernel(%arg0: memref<1x136xf32, #tpu.memory_space<vmem>>, %arg1: memref<8x5xf32, #tpu.memory_space<vmem>>, %arg2: memref<8x1xf32, #tpu.memory_space<vmem>>, %arg3: memref<128x72xf32, #tpu.memory_space<vmem>>, %arg4: memref<128x72xf32, #tpu.memory_space<vmem>>, %arg5: memref<8x40xf32, #tpu.memory_space<vmem>>, %arg6: memref<8x1xf32, #tpu.memory_space<vmem>>, %arg7: memref<64x40xf32, #tpu.memory_space<vmem>>, %arg8: memref<64x40xf32, #tpu.memory_space<vmem>>, %arg9: memref<8x40xf32, #tpu.memory_space<vmem>>, %arg10: memref<8x1xf32, #tpu.memory_space<vmem>>, %arg11: memref<32x16xf32, #tpu.memory_space<vmem>>, %arg12: memref<32x16xf32, #tpu.memory_space<vmem>>, %arg13: memref<32x64xf32, #tpu.memory_space<vmem>>, %arg14: memref<32x1xf32, #tpu.memory_space<vmem>>, %arg15: memref<4x32xf32, #tpu.memory_space<vmem>>, %arg16: memref<4x1xf32, #tpu.memory_space<vmem>>, %arg17: memref<4x2xf32, #tpu.memory_space<vmem>>) attributes {dimension_semantics = [], scalar_prefetch = 0 : i64, scratch_operands = 0 : i64, tpu.core_type = #tpu.core_type<tc>} {
    %c0 = arith.constant 0 : index
    %c0_0 = arith.constant 0 : index
    %0 = vector.load %arg0[%c0, %c0_0] : memref<1x136xf32, #tpu.memory_space<vmem>>, vector<1x136xf32>
    %1 = vector.extract_strided_slice %0 {offsets = [0, 0], sizes = [1, 128], strides = [1, 1]} : vector<1x136xf32> to vector<1x128xf32>
    %2 = vector.extract_strided_slice %0 {offsets = [0, 2], sizes = [1, 128], strides = [1, 1]} : vector<1x136xf32> to vector<1x128xf32>
    %3 = vector.extract_strided_slice %0 {offsets = [0, 4], sizes = [1, 128], strides = [1, 1]} : vector<1x136xf32> to vector<1x128xf32>
    %4 = vector.extract_strided_slice %0 {offsets = [0, 6], sizes = [1, 128], strides = [1, 1]} : vector<1x136xf32> to vector<1x128xf32>
    %5 = vector.extract_strided_slice %0 {offsets = [0, 8], sizes = [1, 128], strides = [1, 1]} : vector<1x136xf32> to vector<1x128xf32>
    %6 = tpu.concatenate %1, %2, %3, %4, %5 in 0 : vector<1x128xf32>, vector<1x128xf32>, vector<1x128xf32>, vector<1x128xf32>, vector<1x128xf32> -> vector<5x128xf32>
    %c0_1 = arith.constant 0 : index
    %c0_2 = arith.constant 0 : index
    %7 = vector.load %arg1[%c0_1, %c0_2] : memref<8x5xf32, #tpu.memory_space<vmem>>, vector<8x5xf32>
    %cst = arith.constant dense<0.000000e+00> : vector<8x128xf32>
    %8 = tpu.matmul %7, %6, %cst {dimension_numbers = #tpu.dot_dimension_numbers<[1], [0], [0], [1], [0, 0, 1, 1], [], []>} : vector<8x5xf32>, vector<5x128xf32>, vector<8x128xf32> -> vector<8x128xf32>
    %c0_3 = arith.constant 0 : index
    %c0_4 = arith.constant 0 : index
    %9 = vector.load %arg2[%c0_3, %c0_4] : memref<8x1xf32, #tpu.memory_space<vmem>>, vector<8x1xf32>
    %10 = vector.broadcast %9 : vector<8x1xf32> to vector<8x128xf32>
    %11 = arith.addf %8, %10 : vector<8x128xf32>
    %cst_5 = arith.constant 0.000000e+00 : f32
    %12 = vector.broadcast %cst_5 : f32 to vector<8x128xf32>
    %13 = arith.maximumf %11, %12 : vector<8x128xf32>
    %c0_6 = arith.constant 0 : index
    %c0_7 = arith.constant 0 : index
    %14 = vector.load %arg3[%c0_6, %c0_7] : memref<128x72xf32, #tpu.memory_space<vmem>>, vector<128x72xf32>
    %cst_8 = arith.constant dense<0.000000e+00> : vector<8x72xf32>
    %15 = tpu.matmul %13, %14, %cst_8 {dimension_numbers = #tpu.dot_dimension_numbers<[1], [0], [0], [1], [0, 0, 1, 1], [], []>} : vector<8x128xf32>, vector<128x72xf32>, vector<8x72xf32> -> vector<8x72xf32>
    %c0_9 = arith.constant 0 : index
    %c0_10 = arith.constant 0 : index
    %16 = vector.load %arg4[%c0_9, %c0_10] : memref<128x72xf32, #tpu.memory_space<vmem>>, vector<128x72xf32>
    %cst_11 = arith.constant dense<0.000000e+00> : vector<8x72xf32>
    %17 = tpu.matmul %13, %16, %cst_11 {dimension_numbers = #tpu.dot_dimension_numbers<[1], [0], [0], [1], [0, 0, 1, 1], [], []>} : vector<8x128xf32>, vector<128x72xf32>, vector<8x72xf32> -> vector<8x72xf32>
    %18 = arith.maximumf %15, %17 : vector<8x72xf32>
    %19 = vector.extract_strided_slice %18 {offsets = [0, 0], sizes = [8, 64], strides = [1, 1]} : vector<8x72xf32> to vector<8x64xf32>
    %20 = vector.extract_strided_slice %18 {offsets = [0, 2], sizes = [8, 64], strides = [1, 1]} : vector<8x72xf32> to vector<8x64xf32>
    %21 = vector.extract_strided_slice %18 {offsets = [0, 4], sizes = [8, 64], strides = [1, 1]} : vector<8x72xf32> to vector<8x64xf32>
    %22 = vector.extract_strided_slice %18 {offsets = [0, 6], sizes = [8, 64], strides = [1, 1]} : vector<8x72xf32> to vector<8x64xf32>
    %23 = vector.extract_strided_slice %18 {offsets = [0, 8], sizes = [8, 64], strides = [1, 1]} : vector<8x72xf32> to vector<8x64xf32>
    %24 = tpu.concatenate %19, %20, %21, %22, %23 in 0 : vector<8x64xf32>, vector<8x64xf32>, vector<8x64xf32>, vector<8x64xf32>, vector<8x64xf32> -> vector<40x64xf32>
    %c0_12 = arith.constant 0 : index
    %c0_13 = arith.constant 0 : index
    %25 = vector.load %arg5[%c0_12, %c0_13] : memref<8x40xf32, #tpu.memory_space<vmem>>, vector<8x40xf32>
    %cst_14 = arith.constant dense<0.000000e+00> : vector<8x64xf32>
    %26 = tpu.matmul %25, %24, %cst_14 {dimension_numbers = #tpu.dot_dimension_numbers<[1], [0], [0], [1], [0, 0, 1, 1], [], []>} : vector<8x40xf32>, vector<40x64xf32>, vector<8x64xf32> -> vector<8x64xf32>
    %c0_15 = arith.constant 0 : index
    %c0_16 = arith.constant 0 : index
    %27 = vector.load %arg6[%c0_15, %c0_16] : memref<8x1xf32, #tpu.memory_space<vmem>>, vector<8x1xf32>
    %28 = vector.broadcast %27 : vector<8x1xf32> to vector<8x64xf32>
    %29 = arith.addf %26, %28 : vector<8x64xf32>
    %cst_17 = arith.constant 0.000000e+00 : f32
    %30 = vector.broadcast %cst_17 : f32 to vector<8x64xf32>
    %31 = arith.maximumf %29, %30 : vector<8x64xf32>
    %c0_18 = arith.constant 0 : index
    %c0_19 = arith.constant 0 : index
    %32 = vector.load %arg7[%c0_18, %c0_19] : memref<64x40xf32, #tpu.memory_space<vmem>>, vector<64x40xf32>
    %cst_20 = arith.constant dense<0.000000e+00> : vector<8x40xf32>
    %33 = tpu.matmul %31, %32, %cst_20 {dimension_numbers = #tpu.dot_dimension_numbers<[1], [0], [0], [1], [0, 0, 1, 1], [], []>} : vector<8x64xf32>, vector<64x40xf32>, vector<8x40xf32> -> vector<8x40xf32>
    %c0_21 = arith.constant 0 : index
    %c0_22 = arith.constant 0 : index
    %34 = vector.load %arg8[%c0_21, %c0_22] : memref<64x40xf32, #tpu.memory_space<vmem>>, vector<64x40xf32>
    %cst_23 = arith.constant dense<0.000000e+00> : vector<8x40xf32>
    %35 = tpu.matmul %31, %34, %cst_23 {dimension_numbers = #tpu.dot_dimension_numbers<[1], [0], [0], [1], [0, 0, 1, 1], [], []>} : vector<8x64xf32>, vector<64x40xf32>, vector<8x40xf32> -> vector<8x40xf32>
    %36 = arith.maximumf %33, %35 : vector<8x40xf32>
    %37 = vector.extract_strided_slice %36 {offsets = [0, 0], sizes = [8, 32], strides = [1, 1]} : vector<8x40xf32> to vector<8x32xf32>
    %38 = vector.extract_strided_slice %36 {offsets = [0, 2], sizes = [8, 32], strides = [1, 1]} : vector<8x40xf32> to vector<8x32xf32>
    %39 = vector.extract_strided_slice %36 {offsets = [0, 4], sizes = [8, 32], strides = [1, 1]} : vector<8x40xf32> to vector<8x32xf32>
    %40 = vector.extract_strided_slice %36 {offsets = [0, 6], sizes = [8, 32], strides = [1, 1]} : vector<8x40xf32> to vector<8x32xf32>
    %41 = vector.extract_strided_slice %36 {offsets = [0, 8], sizes = [8, 32], strides = [1, 1]} : vector<8x40xf32> to vector<8x32xf32>
    %42 = tpu.concatenate %37, %38, %39, %40, %41 in 0 : vector<8x32xf32>, vector<8x32xf32>, vector<8x32xf32>, vector<8x32xf32>, vector<8x32xf32> -> vector<40x32xf32>
    %c0_24 = arith.constant 0 : index
    %c0_25 = arith.constant 0 : index
    %43 = vector.load %arg9[%c0_24, %c0_25] : memref<8x40xf32, #tpu.memory_space<vmem>>, vector<8x40xf32>
    %cst_26 = arith.constant dense<0.000000e+00> : vector<8x32xf32>
    %44 = tpu.matmul %43, %42, %cst_26 {dimension_numbers = #tpu.dot_dimension_numbers<[1], [0], [0], [1], [0, 0, 1, 1], [], []>} : vector<8x40xf32>, vector<40x32xf32>, vector<8x32xf32> -> vector<8x32xf32>
    %c0_27 = arith.constant 0 : index
    %c0_28 = arith.constant 0 : index
    %45 = vector.load %arg10[%c0_27, %c0_28] : memref<8x1xf32, #tpu.memory_space<vmem>>, vector<8x1xf32>
    %46 = vector.broadcast %45 : vector<8x1xf32> to vector<8x32xf32>
    %47 = arith.addf %44, %46 : vector<8x32xf32>
    %cst_29 = arith.constant 0.000000e+00 : f32
    %48 = vector.broadcast %cst_29 : f32 to vector<8x32xf32>
    %49 = arith.maximumf %47, %48 : vector<8x32xf32>
    %c0_30 = arith.constant 0 : index
    %c0_31 = arith.constant 0 : index
    %50 = vector.load %arg11[%c0_30, %c0_31] : memref<32x16xf32, #tpu.memory_space<vmem>>, vector<32x16xf32>
    %cst_32 = arith.constant dense<0.000000e+00> : vector<8x16xf32>
    %51 = tpu.matmul %49, %50, %cst_32 {dimension_numbers = #tpu.dot_dimension_numbers<[1], [0], [0], [1], [0, 0, 1, 1], [], []>} : vector<8x32xf32>, vector<32x16xf32>, vector<8x16xf32> -> vector<8x16xf32>
    %c0_33 = arith.constant 0 : index
    %c0_34 = arith.constant 0 : index
    %52 = vector.load %arg12[%c0_33, %c0_34] : memref<32x16xf32, #tpu.memory_space<vmem>>, vector<32x16xf32>
    %cst_35 = arith.constant dense<0.000000e+00> : vector<8x16xf32>
    %53 = tpu.matmul %49, %52, %cst_35 {dimension_numbers = #tpu.dot_dimension_numbers<[1], [0], [0], [1], [0, 0, 1, 1], [], []>} : vector<8x32xf32>, vector<32x16xf32>, vector<8x16xf32> -> vector<8x16xf32>
    %54 = arith.maximumf %51, %53 : vector<8x16xf32>
    %55 = vector.extract_strided_slice %54 {offsets = [0, 0], sizes = [8, 2], strides = [1, 1]} : vector<8x16xf32> to vector<8x2xf32>
    %56 = vector.extract_strided_slice %54 {offsets = [0, 2], sizes = [8, 2], strides = [1, 1]} : vector<8x16xf32> to vector<8x2xf32>
    %57 = vector.extract_strided_slice %54 {offsets = [0, 4], sizes = [8, 2], strides = [1, 1]} : vector<8x16xf32> to vector<8x2xf32>
    %58 = vector.extract_strided_slice %54 {offsets = [0, 6], sizes = [8, 2], strides = [1, 1]} : vector<8x16xf32> to vector<8x2xf32>
    %59 = vector.extract_strided_slice %54 {offsets = [0, 8], sizes = [8, 2], strides = [1, 1]} : vector<8x16xf32> to vector<8x2xf32>
    %60 = vector.extract_strided_slice %54 {offsets = [0, 10], sizes = [8, 2], strides = [1, 1]} : vector<8x16xf32> to vector<8x2xf32>
    %61 = vector.extract_strided_slice %54 {offsets = [0, 12], sizes = [8, 2], strides = [1, 1]} : vector<8x16xf32> to vector<8x2xf32>
    %62 = vector.extract_strided_slice %54 {offsets = [0, 14], sizes = [8, 2], strides = [1, 1]} : vector<8x16xf32> to vector<8x2xf32>
    %63 = tpu.concatenate %55, %56, %57, %58, %59, %60, %61, %62 in 0 : vector<8x2xf32>, vector<8x2xf32>, vector<8x2xf32>, vector<8x2xf32>, vector<8x2xf32>, vector<8x2xf32>, vector<8x2xf32>, vector<8x2xf32> -> vector<64x2xf32>
    %c0_36 = arith.constant 0 : index
    %c0_37 = arith.constant 0 : index
    %64 = vector.load %arg13[%c0_36, %c0_37] : memref<32x64xf32, #tpu.memory_space<vmem>>, vector<32x64xf32>
    %cst_38 = arith.constant dense<0.000000e+00> : vector<32x2xf32>
    %65 = tpu.matmul %64, %63, %cst_38 {dimension_numbers = #tpu.dot_dimension_numbers<[1], [0], [0], [1], [0, 0, 1, 1], [], []>} : vector<32x64xf32>, vector<64x2xf32>, vector<32x2xf32> -> vector<32x2xf32>
    %c0_39 = arith.constant 0 : index
    %c0_40 = arith.constant 0 : index
    %66 = vector.load %arg14[%c0_39, %c0_40] : memref<32x1xf32, #tpu.memory_space<vmem>>, vector<32x1xf32>
    %67 = vector.broadcast %66 : vector<32x1xf32> to vector<32x2xf32>
    %68 = arith.addf %65, %67 : vector<32x2xf32>
    %cst_41 = arith.constant 0.000000e+00 : f32
    %69 = vector.broadcast %cst_41 : f32 to vector<32x2xf32>
    %70 = arith.maximumf %68, %69 : vector<32x2xf32>
    %c0_42 = arith.constant 0 : index
    %c0_43 = arith.constant 0 : index
    %71 = vector.load %arg15[%c0_42, %c0_43] : memref<4x32xf32, #tpu.memory_space<vmem>>, vector<4x32xf32>
    %cst_44 = arith.constant dense<0.000000e+00> : vector<4x2xf32>
    %72 = tpu.matmul %71, %70, %cst_44 {dimension_numbers = #tpu.dot_dimension_numbers<[1], [0], [0], [1], [0, 0, 1, 1], [], []>} : vector<4x32xf32>, vector<32x2xf32>, vector<4x2xf32> -> vector<4x2xf32>
    %c0_45 = arith.constant 0 : index
    %c0_46 = arith.constant 0 : index
    %73 = vector.load %arg16[%c0_45, %c0_46] : memref<4x1xf32, #tpu.memory_space<vmem>>, vector<4x1xf32>
    %74 = vector.broadcast %73 : vector<4x1xf32> to vector<4x2xf32>
    %75 = arith.addf %72, %74 : vector<4x2xf32>
    %c0_47 = arith.constant 0 : index
    %c0_48 = arith.constant 0 : index
    %76 = vector.load %arg17[%c0_47, %c0_48] : memref<4x2xf32, #tpu.memory_space<vmem>>, vector<4x2xf32>
    tpu.vector_store %arg17[%c0_47, %c0_48], %75 {strides = array<i32>} : memref<4x2xf32, #tpu.memory_space<vmem>>, vector<4x2xf32>,
    return
  }
}

</mosaic_0001>

<bundles_post_ra>
// kernel: cnn1d_forward.1
= control target key start
LH: loop header
LB: loop body
LE: loop exit
PB: predicated region body
PF: predicated region fallthrough
CT: control target
= control target key end

     0   :  { %v58_v0 = vlaneseq  ;;  %s1413_s27 = smov 124   ;;  %s1414_s28 = smov 126   ;;  %v1415_v7 = vmov 0.0   ;;  %vm1416_vm0 = vmmov 0   ;;  %v1417_v8 = vmov 0   ;;  %s1862_s0 = inlined_call_operand.vmem [shape: f32[1,136], index: 0, kind: input, shape index: {}]   ;;  %s1863_s4 = inlined_call_operand.vmem [shape: f32[128,72], index: 4, kind: input, shape index: {}]   ;;  %s1864_s2 = inlined_call_operand.vmem [shape: f32[8,1], index: 2, kind: input, shape index: {}]   ;;  %s1865_s1 = inlined_call_operand.vmem [shape: f32[8,5], index: 1, kind: input, shape index: {}]   ;;  %s1866_s3 = inlined_call_operand.vmem [shape: f32[128,72], index: 3, kind: input, shape index: {}]   ;;  %s1867_s6 = inlined_call_operand.vmem [shape: f32[8,1], index: 6, kind: input, shape index: {}]   ;;  %s1868_s7 = inlined_call_operand.vmem [shape: f32[64,40], index: 7, kind: input, shape index: {}]   ;;  %s1869_s5 = inlined_call_operand.vmem [shape: f32[8,40], index: 5, kind: input, shape index: {}]   ;;  %s1870_s8 = inlined_call_operand.vmem [shape: f32[64,40], index: 8, kind: input, shape index: {}]   ;;  %s1871_s10 = inlined_call_operand.vmem [shape: f32[8,1], index: 10, kind: input, shape index: {}]   ;;  %s1872_s9 = inlined_call_operand.vmem [shape: f32[8,40], index: 9, kind: input, shape index: {}]   ;;  %s1873_s11 = inlined_call_operand.vmem [shape: f32[32,16], index: 11, kind: input, shape index: {}]   ;;  %s1874_s12 = inlined_call_operand.vmem [shape: f32[32,16], index: 12, kind: input, shape index: {}]   ;;  %s1875_s13 = inlined_call_operand.vmem [shape: f32[32,64], index: 13, kind: input, shape index: {}]   ;;  %s1876_s14 = inlined_call_operand.vmem [shape: f32[32,1], index: 14, kind: input, shape index: {}]   ;;  %s1877_s16 = inlined_call_operand.vmem [shape: f32[4,1], index: 16, kind: input, shape index: {}]   ;;  %s1878_s15 = inlined_call_operand.vmem [shape: f32[4,32], index: 15, kind: input, shape index: {}]   ;;  %s1879_s17 = inlined_call_operand.vmem [shape: f32[4,2], index: 17, kind: output, shape index: {}]  }
   0x1   :  { %1881 = sst [smem:[#allocation2_spill]] %s1862_s0  ;;  %1207 = vmatprep.subr.mxu1 %v1415_v7  ;;  %1209 = vmatprep.mubr.msk.f32.mxu1 %vm1416_vm0, %v1415_v7  ;;  %s1418_s21 = smov 122   ;;  %v103_v14 = vld [vmem:[%s1864_s2] sm:$0xff]  ;;  %vm70_vm1 = vcmask 1031168   ;;  %vm77_vm2 = vcmask 1014784   ;;  %vm94_vm3 = vcmask 1040384  }
   0x2   :  { %1882 = sst [smem:[#allocation3_spill]] %s1863_s4  ;;  %v59_v1 = vshrl.u32 %v58_v0, 7  ;;  %1247 = vmatprep.subr.mxu0 %v1415_v7  ;;  %1279 = vmatprep.mubr.msk.f32.mxu0 %vm1416_vm0, %v1415_v7  ;;  %s1419_s24 = smov 120   ;;  %vm84_vm4 = vcmask 998400   ;;  %vm96_vm5 = vcmask 1041408   ;;  %vm91_vm6 = vcmask 982016  }
   0x3   :  { %s1883_s26 = sld [smem:[#allocation2_spill]]  ;;  %1411 = vset.pattern.permute.xlu0 %v1417_v8  ;;  %1412 = vset.pattern.permute.xlu1 %v1417_v8  ;;  %vm98_vm7 = vcmask 1042432   ;;  %vm100_vm8 = vcmask 1043456   ;;  %vm113_vm9 = vcmask 1044480   ;;  %v102_v38 = vld [vmem:[%s1865_s1] sm:$0xff]  ;;  %vm109_vm10 = vcmask 39936  }
   0x4   :  { %v60_v3 = vsub.s32 0, %v59_v1  ;;  %v64_v4 = vsub.s32 1, %v59_v1  ;;  %s1884_s30 = sld [smem:[#allocation3_spill]]  ;;  %v203_v40 = vld [vmem:[%s1866_s3 + $0x78] sm:$0xff]  ;;  %v202_v41 = vld [vmem:[%s1866_s3 + $0x70] sm:$0xff]  ;;  %v201_v42 = vld [vmem:[%s1866_s3 + $0x68] sm:$0xff] }
   0x5   :  { %v200_v43 = vld [vmem:[%s1866_s3 + $0x60] sm:$0xff]  ;;  %v199_v44 = vld [vmem:[%s1866_s3 + $0x58] sm:$0xff]  ;;  %v198_v45 = vld [vmem:[%s1866_s3 + $0x50] sm:$0xff]  ;;  %vm381_vm11 = vcmask 326656   ;;  %vm464_vm12 = vcmask 523264   ;;  %vm715_vm13 = vcmask 261120  }
   0x6   :  { %v197_v46 = vld [vmem:[%s1866_s3 + $0x48] sm:$0xff]  ;;  %v196_v47 = vld [vmem:[%s1866_s3 + $0x40] sm:$0xff]  ;;  %v195_v48 = vld [vmem:[%s1866_s3 + $0x38] sm:$0xff]  ;;  %s1420_s0 = smov 116   ;;  %s1422_s1 = smov 118   ;;  %vm1095_vm14 = vcmask 11264  }
   0x7   :  { %v194_v49 = vld [vmem:[%s1866_s3 + $0x30] sm:$0xff]  ;;  %v193_v50 = vld [vmem:[%s1866_s3 + $0x28] sm:$0xff]  ;;  %v192_v51 = vld [vmem:[%s1866_s3 + $0x20] sm:$0xff] }
   0x8   :  { %v191_v52 = vld [vmem:[%s1866_s3 + $0x18] sm:$0xff]  ;;  %v190_v53 = vld [vmem:[%s1866_s3 + $0x10] sm:$0xff]  ;;  %v189_v55 = vld [vmem:[%s1866_s3 + $0x8] sm:$0xff] }
   0x9   :  { %v1516_v2 = vld [vmem:[%s1883_s26] sm:$0x3]  ;;  %v462_v8 = vld [vmem:[%s1868_s7 + $0x30] sm:$0xff] }
   0xa   :  { %v61_v5 = vrot.slane %v1516_v2, %v60_v3  ;;  %v65_v6 = vrot.slane %v1516_v2, %v64_v4  ;;  %v289_v9 = vld [vmem:[%s1884_s30 + $0x78] sm:$0xff]  ;;  %v288_v10 = vld [vmem:[%s1884_s30 + $0x70] sm:$0xff]  ;;  %v287_v11 = vld [vmem:[%s1884_s30 + $0x68] sm:$0xff] }
   0xb   :  { %1248 = vmatpush3.msra.mxu0 %v289_v9  ;;  %v286_v12 = vld [vmem:[%s1884_s30 + $0x60] sm:$0xff]  ;;  %v285_v13 = vld [vmem:[%s1884_s30 + $0x58] sm:$0xff]  ;;  %v284_v15 = vld [vmem:[%s1884_s30 + $0x50] sm:$0xff] }
   0xc   :  { %73 = vrot.lane.b32.xlu1 %v61_v5, %s1413_s27  ;;  %66 = vrot.lane.b32.xlu0 %v61_v5, %s1414_s28  ;;  %v283_v16 = vld [vmem:[%s1884_s30 + $0x48] sm:$0xff]  ;;  %v282_v17 = vld [vmem:[%s1884_s30 + $0x40] sm:$0xff] }
   0xd   :  { %1249 = vmatprep.subr.mxu0 %v1415_v7  ;;  %v281_v18 = vld [vmem:[%s1884_s30 + $0x38] sm:$0xff]  ;;  %v280_v19 = vld [vmem:[%s1884_s30 + $0x30] sm:$0xff]  ;;  %v279_v20 = vld [vmem:[%s1884_s30 + $0x28] sm:$0xff] }
   0xe   :  { %1250 = vmatpush3.msra.mxu0 %v288_v10  ;;  %v278_v21 = vld [vmem:[%s1884_s30 + $0x20] sm:$0xff]  ;;  %v277_v22 = vld [vmem:[%s1884_s30 + $0x18] sm:$0xff]  ;;  %v276_v54 = vld [vmem:[%s1884_s30 + $0x10] sm:$0xff] }
   0xf   :  { %1251 = vmatprep.subr.mxu0 %v1415_v7  ;;  %v275_v56 = vld [vmem:[%s1884_s30 + $0x8] sm:$0xff]  ;;  %v188_v57 = vld [vmem:[%s1866_s3] sm:$0xff] }
  0x10   :  { %75 = vrot.lane.b32.xlu1 %v65_v6, %s1413_s27  ;;  %68 = vrot.lane.b32.xlu0 %v65_v6, %s1414_s28  ;;  %v274_v58 = vld [vmem:[%s1884_s30] sm:$0xff]  ;;  %v461_v9 = vld [vmem:[%s1868_s7 + $0x28] sm:$0xff] }
  0x11   :  { %1252 = vmatpush3.msra.mxu0 %v287_v11  ;;  %v460_v10 = vld [vmem:[%s1868_s7 + $0x20] sm:$0xff]  ;;  %v459_v11 = vld [vmem:[%s1868_s7 + $0x18] sm:$0xff] }
  0x12   :  { %1253 = vmatprep.subr.mxu0 %v1415_v7 }
  0x13   :  { %1254 = vmatpush3.msra.mxu0 %v286_v12 }
  0x14   :  { %82 = vrot.lane.b32.xlu1 %v65_v6, %s1418_s21  ;;  %80 = vrot.lane.b32.xlu0 %v61_v5, %s1418_s21 }
  0x15   :  { %1255 = vmatprep.subr.mxu0 %v1415_v7 }
  0x16   :  { %1256 = vmatpush3.msra.mxu0 %v285_v13 }
  0x17   :  { %1257 = vmatprep.subr.mxu0 %v1415_v7 }
  0x18   :  { %89 = vrot.lane.b32.xlu1 %v65_v6, %s1419_s24  ;;  %87 = vrot.lane.b32.xlu0 %v61_v5, %s1419_s24  ;;  %v463_v5 = vld [vmem:[%s1868_s7 + $0x38] sm:$0xff]  ;;  %v375_v6 = vld [vmem:[%s1867_s6] sm:$0xff] }
  0x19   :  { %1258 = vmatpush3.msra.mxu0 %v284_v15 }
  0x1a   :  { %1259 = vmatprep.subr.mxu0 %v1415_v7 }
  0x1b   :  { %1260 = vmatpush3.msra.mxu0 %v283_v16  ;;  %v374_v16 = vld [vmem:[%s1869_s5] sm:$0xff] }
  0x1c   :  { %106 = vperm.xlu0 %1411, %v103_v14   ;;  %1261 = vmatprep.subr.mxu0 %v1415_v7 }
  0x1d   :  { %1262 = vmatpush3.msra.mxu0 %v282_v17  ;;  %v545_v17 = vld [vmem:[%s1870_s8 + $0x38] sm:$0xff] }
  0x1e   :  { %1263 = vmatprep.subr.mxu0 %v1415_v7 }
  0x1f   :  { %1264 = vmatpush3.msra.mxu0 %v281_v18  ;;  %v544_v18 = vld [vmem:[%s1870_s8 + $0x30] sm:$0xff] }
  0x20   :  { %1265 = vmatprep.subr.mxu0 %v1415_v7 }
  0x21   :  { %1266 = vmatpush3.msra.mxu0 %v280_v19  ;;  %v543_v19 = vld [vmem:[%s1870_s8 + $0x28] sm:$0xff] }
  0x22   :  { %1267 = vmatprep.subr.mxu0 %v1415_v7 }
  0x23   :  { %1268 = vmatpush3.msra.mxu0 %v279_v20  ;;  %v542_v20 = vld [vmem:[%s1870_s8 + $0x20] sm:$0xff] }
  0x24   :  { %1269 = vmatprep.subr.mxu0 %v1415_v7 }
  0x25   :  { %1270 = vmatpush3.msra.mxu0 %v278_v21  ;;  %v541_v21 = vld [vmem:[%s1870_s8 + $0x18] sm:$0xff] }
  0x26   :  { %1271 = vmatprep.subr.mxu0 %v1415_v7 }
  0x27   :  { %1272 = vmatpush3.msra.mxu0 %v277_v22  ;;  %v458_v22 = vld [vmem:[%s1868_s7 + $0x10] sm:$0xff] }
  0x28   :  { %1273 = vmatprep.subr.mxu0 %v1415_v7 }
  0x29   :  { %1274 = vmatpush3.msra.mxu0 %v276_v54  ;;  %v791_v54 = vld [vmem:[%s1874_s12 + $0x10] sm:$0xff] }
  0x2a   :  { %1275 = vmatprep.subr.mxu0 %v1415_v7 }
  0x2b   :  { %1276 = vmatpush3.msra.mxu0 %v275_v56  ;;  %v789_v56 = vld [vmem:[%s1874_s12] sm:$0xff] }
  0x2c   :  { %1277 = vmatprep.subr.mxu0 %v1415_v7 }
  0x2d   :  { %1278 = vmatpush3.msra.mxu0 %v274_v58 }
  0x2e   :  { %1295 = vmatprep.subr.mxu0 %v1415_v7 }
  0x7e   :  { %v74_v23 = vpop.permute.xlu1 %73  ;;  %v67_v24 = vpop.permute.xlu0 %66 }
  0x82   :  { %v76_v25 = vpop.permute.xlu1 %75  ;;  %v69_v26 = vpop.permute.xlu0 %68 }
  0x83   :  { %v71_v27 = vsel %vm70_vm1, %v67_v24, %v69_v26  ;;  %v78_v30 = vsel %vm77_vm2, %v74_v23, %v76_v25  ;;  %v540_v23 = vld [vmem:[%s1870_s8 + $0x10] sm:$0xff]  ;;  %v457_v24 = vld [vmem:[%s1868_s7 + $0x8] sm:$0xff]  ;;  %v456_v26 = vld [vmem:[%s1868_s7] sm:$0xff]  ;;  %s1421_s7 = smov 114  }
  0x84   :  { %v95_v31 = vsel %vm94_vm3, %v1516_v2, %v71_v27  ;;  %v539_v25 = vld [vmem:[%s1870_s8 + $0x8] sm:$0xff]  ;;  %v538_v27 = vld [vmem:[%s1870_s8] sm:$0xff] }
  0x85   :  { %v97_v35 = vsel %vm96_vm5, %v95_v31, %v78_v30 }
  0x86   :  { %v83_v28 = vpop.permute.xlu1 %82  ;;  %v81_v29 = vpop.permute.xlu0 %80 }
  0x87   :  { %v85_v32 = vsel %vm84_vm4, %v81_v29, %v83_v28 }
  0x88   :  { %v99_v37 = vsel %vm98_vm7, %v97_v35, %v85_v32 }
  0x8a   :  { %v90_v33 = vpop.permute.xlu1 %89  ;;  %v88_v34 = vpop.permute.xlu0 %87 }
  0x8b   :  { %v92_v36 = vsel %vm91_vm6, %v88_v34, %v90_v33 }
  0x8c   :  { %v101_v39 = vsel %vm100_vm8, %v99_v37, %v92_v36 }
  0x8d   :  { %1208 = vmatpush3.msk.msra.mxu1 %vm113_vm9, %v101_v39 }
  0x8e   :  { %1210 = vmatmul.mubr.msk.f32.vlgmr.msra.gmra.mxu1 %vm109_vm10, %v102_v38  ;;  %1212 = vmatprep.subr.mxu1 %v1415_v7  ;;  %v631_v38 = vld [vmem:[%s1871_s10] sm:$0xff] }
  0x8f   :  { %1213 = vmatpush3.msra.mxu1 %v203_v40  ;;  %1244 = vmatprep.mubr.msk.f32.mxu1 %vm1416_vm0, %v1415_v7 }
  0x90   :  { %1214 = vmatprep.subr.mxu1 %v1415_v7 }
  0x91   :  { %1215 = vmatpush3.msra.mxu1 %v202_v41 }
  0x92   :  { %1216 = vmatprep.subr.mxu1 %v1415_v7 }
  0x93   :  { %1217 = vmatpush3.msra.mxu1 %v201_v42 }
  0x94   :  { %1218 = vmatprep.subr.mxu1 %v1415_v7 }
  0x95   :  { %1219 = vmatpush3.msra.mxu1 %v200_v43  ;;  %v630_v43 = vld [vmem:[%s1872_s9] sm:$0xff] }
  0x96   :  { %1220 = vmatprep.subr.mxu1 %v1415_v7 }
  0x97   :  { %1221 = vmatpush3.msra.mxu1 %v199_v44  ;;  %v107_v59 = vpop.permute.xlu0 %106  ;;  %v714_v44 = vld [vmem:[%s1873_s11 + $0x18] sm:$0xff] }
  0x98   :  { %1222 = vmatprep.subr.mxu1 %v1415_v7 }
  0x99   :  { %1223 = vmatpush3.msra.mxu1 %v198_v45  ;;  %v713_v45 = vld [vmem:[%s1873_s11 + $0x10] sm:$0xff] }
  0x9a   :  { %1224 = vmatprep.subr.mxu1 %v1415_v7 }
  0x9b   :  { %1225 = vmatpush3.msra.mxu1 %v197_v46  ;;  %v712_v46 = vld [vmem:[%s1873_s11 + $0x8] sm:$0xff] }
  0x9c   :  { %1226 = vmatprep.subr.mxu1 %v1415_v7 }
  0x9d   :  { %1227 = vmatpush3.msra.mxu1 %v196_v47  ;;  %v711_v47 = vld [vmem:[%s1873_s11] sm:$0xff] }
  0x9e   :  { %1228 = vmatprep.subr.mxu1 %v1415_v7 }
  0x9f   :  { %1229 = vmatpush3.msra.mxu1 %v195_v48 }
  0xa0   :  { %1230 = vmatprep.subr.mxu1 %v1415_v7 }
  0xa1   :  { %1231 = vmatpush3.msra.mxu1 %v194_v49 }
  0xa2   :  { %1232 = vmatprep.subr.mxu1 %v1415_v7 }
  0xa3   :  { %1233 = vmatpush3.msra.mxu1 %v193_v50 }
  0xa4   :  { %1234 = vmatprep.subr.mxu1 %v1415_v7 }
  0xa5   :  { %1235 = vmatpush3.msra.mxu1 %v192_v51 }
  0xa6   :  { %1236 = vmatprep.subr.mxu1 %v1415_v7 }
  0xa7   :  { %1237 = vmatpush3.msra.mxu1 %v191_v52 }
  0xa8   :  { %1238 = vmatprep.subr.mxu1 %v1415_v7 }
  0xa9   :  { %1239 = vmatpush3.msra.mxu1 %v190_v53  ;;  %v792_v53 = vld [vmem:[%s1874_s12 + $0x18] sm:$0xff] }
  0xaa   :  { %1240 = vmatprep.subr.mxu1 %v1415_v7 }
  0xab   :  { %1241 = vmatpush3.msra.mxu1 %v189_v55  ;;  %v790_v55 = vld [vmem:[%s1874_s12 + $0x8] sm:$0xff] }
  0xac   :  { %1242 = vmatprep.subr.mxu1 %v1415_v7 }
  0xad   :  { %1243 = vmatpush3.msra.mxu1 %v188_v57 }
  0xae   :  { %1282 = vmatprep.subr.mxu1 %v1415_v7 }
 0x14e   :  { %v183_v60 = vpop.f32.mrf.mxu1 }
 0x14f   :  { %v184_v61 = vadd.f32 %v183_v60, %v107_v59 }
 0x150   :  { %v1211_v62 = vpop.f32.mrf.mxu1 }
 0x151   :  { %v187_v63 = vmax.f32 %v184_v61, 0.0  ;;  %v886_v62 = vld [vmem:[%s1875_s13] sm:$0xff] }
 0x153   :  { %1245 = vmatmul.mubr.f32.vlgmr.msra.gmra.mxu1 %v187_v63  ;;  %1280 = vmatmul.mubr.f32.vlgmr.msra.gmra.mxu0 %v187_v63  ;;  %v893_v63 = vld [vmem:[%s1876_s14 + $0x18] sm:$0xff] }
 0x154   :  { %1292 = vmatprep.mubr.msk.f32.mxu1 %vm1416_vm0, %v1415_v7  ;;  %1311 = vmatprep.mubr.msk.f32.mxu0 %vm1416_vm0, %v1415_v7 }
 0x155   :  { %1296 = vmatpush3.msra.mxu0 %v463_v5 }
 0x156   :  { %1297 = vmatprep.subr.mxu0 %v1415_v7 }
 0x157   :  { %1298 = vmatpush3.msra.mxu0 %v462_v8 }
 0x158   :  { %1299 = vmatprep.subr.mxu0 %v1415_v7 }
 0x159   :  { %1300 = vmatpush3.msra.mxu0 %v461_v9 }
 0x15a   :  { %1301 = vmatprep.subr.mxu0 %v1415_v7 }
 0x15b   :  { %1302 = vmatpush3.msra.mxu0 %v460_v10 }
 0x15c   :  { %1303 = vmatprep.subr.mxu0 %v1415_v7 }
 0x15d   :  { %1304 = vmatpush3.msra.mxu0 %v459_v11 }
 0x15e   :  { %1305 = vmatprep.subr.mxu0 %v1415_v7 }
 0x15f   :  { %1306 = vmatpush3.msra.mxu0 %v458_v22 }
 0x160   :  { %1307 = vmatprep.subr.mxu0 %v1415_v7 }
 0x161   :  { %1308 = vmatpush3.msra.mxu0 %v457_v24 }
 0x162   :  { %1309 = vmatprep.subr.mxu0 %v1415_v7 }
 0x163   :  { %1310 = vmatpush3.msra.mxu0 %v456_v26 }
 0x164   :  { %1333 = vmatprep.subr.mxu0 %v1415_v7 }
 0x213   :  { %v270_v0 = vpop.f32.mrf.mxu1  ;;  %v356_v1 = vpop.f32.mrf.mxu0 }
 0x214   :  { %v360_v2 = vmax.f32 %v270_v0, %v356_v1  ;;  %v891_v0 = vld [vmem:[%s1876_s14 + $0x8] sm:$0xff]  ;;  %v892_v1 = vld [vmem:[%s1876_s14 + $0x10] sm:$0xff] }
 0x215   :  { %v1246_v3 = vpop.f32.mrf.mxu1  ;;  %v1281_v4 = vpop.f32.mrf.mxu0 }
 0x216   :  { %365 = vrot.lane.b32.xlu0 %v360_v2, %s1413_s27  ;;  %371 = vrot.lane.b32.xlu1 %v360_v2, %s1419_s24  ;;  %v890_v3 = vld [vmem:[%s1876_s14] sm:$0xff] }
 0x21a   :  { %378 = vperm.xlu0 %1411, %v375_v6   ;;  %368 = vrot.lane.b32.xlu1 %v360_v2, %s1418_s21 }
 0x21e   :  { %362 = vrot.lane.b32.xlu1 %v360_v2, %s1414_s28 }
 0x288   :  { %v372_v12 = vpop.permute.xlu1 %371  ;;  %v366_v14 = vpop.permute.xlu0 %365 }
 0x289   :  { %1283 = vmatpush3.msra.mxu1 %v372_v12  ;;  %v887_v12 = vld [vmem:[%s1875_s13 + $0x8] sm:$0xff] }
 0x28a   :  { %1284 = vmatprep.subr.mxu1 %v1415_v7 }
 0x28c   :  { %v369_v13 = vpop.permute.xlu1 %368 }
 0x28d   :  { %1285 = vmatpush3.msra.mxu1 %v369_v13  ;;  %v888_v13 = vld [vmem:[%s1875_s13 + $0x10] sm:$0xff] }
 0x28e   :  { %1286 = vmatprep.subr.mxu1 %v1415_v7 }
 0x28f   :  { %1287 = vmatpush3.msra.mxu1 %v366_v14  ;;  %v889_v14 = vld [vmem:[%s1875_s13 + $0x18] sm:$0xff] }
 0x290   :  { %1288 = vmatprep.subr.mxu1 %v1415_v7  ;;  %v363_v15 = vpop.permute.xlu1 %362 }
 0x291   :  { %1289 = vmatpush3.msra.mxu1 %v363_v15 }
 0x292   :  { %1290 = vmatprep.subr.mxu1 %v1415_v7 }
 0x293   :  { %1291 = vmatpush3.msra.mxu1 %v360_v2  ;;  %v1016_v2 = vld [vmem:[%s1877_s16] sm:$0xf] }
 0x294   :  { %1293 = vmatmul.mubr.msk.f32.vlgmr.msra.gmra.mxu1 %vm381_vm11, %v374_v16  ;;  %1314 = vmatprep.subr.mxu1 %v1415_v7 }
 0x295   :  { %1315 = vmatpush3.msra.mxu1 %v545_v17  ;;  %1330 = vmatprep.mubr.msk.f32.mxu1 %vm1416_vm0, %v1415_v7  ;;  %v379_v28 = vpop.permute.xlu0 %378 }
 0x296   :  { %1316 = vmatprep.subr.mxu1 %v1415_v7 }
 0x297   :  { %1317 = vmatpush3.msra.mxu1 %v544_v18 }
 0x298   :  { %1318 = vmatprep.subr.mxu1 %v1415_v7 }
 0x299   :  { %1319 = vmatpush3.msra.mxu1 %v543_v19 }
 0x29a   :  { %1320 = vmatprep.subr.mxu1 %v1415_v7 }
 0x29b   :  { %1321 = vmatpush3.msra.mxu1 %v542_v20 }
 0x29c   :  { %1322 = vmatprep.subr.mxu1 %v1415_v7 }
 0x29d   :  { %1323 = vmatpush3.msra.mxu1 %v541_v21 }
 0x29e   :  { %1324 = vmatprep.subr.mxu1 %v1415_v7 }
 0x29f   :  { %1325 = vmatpush3.msra.mxu1 %v540_v23 }
 0x2a0   :  { %1326 = vmatprep.subr.mxu1 %v1415_v7 }
 0x2a1   :  { %1327 = vmatpush3.msra.mxu1 %v539_v25 }
 0x2a2   :  { %1328 = vmatprep.subr.mxu1 %v1415_v7 }
 0x2a3   :  { %1329 = vmatpush3.msra.mxu1 %v538_v27 }
 0x354   :  { %v451_v29 = vpop.f32.mrf.mxu1 }
 0x355   :  { %v452_v30 = vadd.f32 %v451_v29, %v379_v28 }
 0x356   :  { %v1294_v31 = vpop.f32.mrf.mxu1 }
 0x357   :  { %v455_v32 = vmax.f32 %v452_v30, 0.0  ;;  %v1015_v31 = vld [vmem:[%s1878_s15] sm:$0xf] }
 0x359   :  { %1312 = vmatmul.mubr.msk.f32.vlgmr.msra.gmra.mxu0 %vm464_vm12, %v455_v32  ;;  %1331 = vmatmul.mubr.msk.f32.vlgmr.msra.gmra.mxu1 %vm464_vm12, %v455_v32 }
 0x35a   :  { %1343 = vmatprep.mubr.msk.f32.mxu0 %vm1416_vm0, %v1415_v7  ;;  %1384 = vmatprep.mubr.msk.f32.mxu1 %vm464_vm12, %v886_v62 }
 0x419   :  { %v534_v33 = vpop.f32.mrf.mxu0  ;;  %v612_v34 = vpop.f32.mrf.mxu1 }
 0x41a   :  { %v616_v35 = vmax.f32 %v534_v33, %v612_v34 }
 0x41b   :  { %v1313_v36 = vpop.f32.mrf.mxu0  ;;  %v1332_v37 = vpop.f32.mrf.mxu1 }
 0x41c   :  { %624 = vrot.lane.b32.xlu0 %v616_v35, %s1418_s21  ;;  %627 = vrot.lane.b32.xlu1 %v616_v35, %s1419_s24 }
 0x420   :  { %618 = vrot.lane.b32.xlu0 %v616_v35, %s1414_s28  ;;  %621 = vrot.lane.b32.xlu1 %v616_v35, %s1413_s27 }
 0x424   :  { %634 = vperm.xlu1 %1412, %v631_v38  }
 0x48e   :  { %v625_v39 = vpop.permute.xlu0 %624  ;;  %v628_v40 = vpop.permute.xlu1 %627 }
 0x48f   :  { %1334 = vmatpush3.msra.mxu0 %v628_v40 }
 0x490   :  { %1335 = vmatprep.subr.mxu0 %v1415_v7 }
 0x491   :  { %1336 = vmatpush3.msra.mxu0 %v625_v39 }
 0x492   :  { %1337 = vmatprep.subr.mxu0 %v1415_v7  ;;  %v622_v41 = vpop.permute.xlu1 %621  ;;  %v619_v42 = vpop.permute.xlu0 %618 }
 0x493   :  { %1338 = vmatpush3.msra.mxu0 %v622_v41 }
 0x494   :  { %1339 = vmatprep.subr.mxu0 %v1415_v7 }
 0x495   :  { %1340 = vmatpush3.msra.mxu0 %v619_v42 }
 0x496   :  { %1341 = vmatprep.subr.mxu0 %v1415_v7 }
 0x497   :  { %1342 = vmatpush3.msra.mxu0 %v616_v35 }
 0x498   :  { %1344 = vmatmul.mubr.msk.f32.vlgmr.msra.gmra.mxu0 %vm381_vm11, %v630_v43  ;;  %1346 = vmatprep.subr.mxu0 %v1415_v7 }
 0x499   :  { %1347 = vmatpush3.msra.mxu0 %v714_v44  ;;  %1354 = vmatprep.mubr.msk.f32.mxu0 %vm1416_vm0, %v1415_v7 }
 0x49a   :  { %1348 = vmatprep.subr.mxu0 %v1415_v7 }
 0x49b   :  { %1349 = vmatpush3.msra.mxu0 %v713_v45 }
 0x49c   :  { %1350 = vmatprep.subr.mxu0 %v1415_v7 }
 0x49d   :  { %1351 = vmatpush3.msra.mxu0 %v712_v46 }
 0x49e   :  { %1352 = vmatprep.subr.mxu0 %v1415_v7 }
 0x49f   :  { %1353 = vmatpush3.msra.mxu0 %v711_v47  ;;  %v635_v48 = vpop.permute.xlu1 %634 }
 0x4a0   :  { %1357 = vmatprep.subr.mxu0 %v1415_v7 }
 0x558   :  { %v706_v49 = vpop.f32.mrf.mxu0 }
 0x559   :  { %v707_v50 = vadd.f32 %v706_v49, %v635_v48 }
 0x55a   :  { %v1345_v51 = vpop.f32.mrf.mxu0 }
 0x55b   :  { %v710_v52 = vmax.f32 %v707_v50, 0.0 }
 0x55d   :  { %1355 = vmatmul.mubr.msk.f32.vlgmr.msra.gmra.mxu0 %vm715_vm13, %v710_v52 }
 0x55e   :  { %1358 = vmatpush3.msra.mxu0 %v792_v53  ;;  %1365 = vmatprep.mubr.msk.f32.mxu0 %vm1416_vm0, %v1415_v7 }
 0x55f   :  { %1359 = vmatprep.subr.mxu0 %v1415_v7 }
 0x560   :  { %1360 = vmatpush3.msra.mxu0 %v791_v54 }
 0x561   :  { %1361 = vmatprep.subr.mxu0 %v1415_v7 }
 0x562   :  { %1362 = vmatpush3.msra.mxu0 %v790_v55 }
 0x563   :  { %1363 = vmatprep.subr.mxu0 %v1415_v7 }
 0x564   :  { %1364 = vmatpush3.msra.mxu0 %v789_v56 }
 0x565   :  { %1366 = vmatmul.mubr.msk.f32.vlgmr.msra.gmra.mxu0 %vm715_vm13, %v710_v52  ;;  %1390 = vmatprep.subr.mxu0 %v1415_v7 }
 0x566   :  { %1398 = vmatprep.mubr.msk.f32.mxu0 %vm1416_vm0, %v1415_v7 }
 0x61d   :  { %v785_v57 = vpop.f32.mrf.mxu0 }
 0x61f   :  { %v1356_v58 = vpop.f32.mrf.mxu0 }
 0x625   :  { %v859_v59 = vpop.f32.mrf.mxu0 }
 0x626   :  { %v863_v60 = vmax.f32 %v785_v57, %v859_v59 }
 0x627   :  { %v1367_v61 = vpop.f32.mrf.mxu0 }
 0x628   :  { %880 = vrot.lane.b32.xlu1 %v863_v60, %s1420_s0  ;;  %883 = vrot.lane.b32.xlu0 %v863_v60, %s1421_s7 }
 0x62c   :  { %874 = vrot.lane.b32.xlu1 %v863_v60, %s1419_s24  ;;  %877 = vrot.lane.b32.xlu0 %v863_v60, %s1422_s1 }
 0x630   :  { %868 = vrot.lane.b32.xlu1 %v863_v60, %s1413_s27  ;;  %871 = vrot.lane.b32.xlu0 %v863_v60, %s1418_s21 }
 0x634   :  { %911 = vperm.xlu1 %1412, %v893_v63   ;;  %865 = vrot.lane.b32.xlu0 %v863_v60, %s1414_s28 }
 0x638   :  { %901 = vperm.xlu1 %1412, %v891_v0   ;;  %906 = vperm.xlu0 %1411, %v892_v1  }
 0x63c   :  { %1019 = vperm.xlu1 %1412, %v1016_v2   ;;  %896 = vperm.xlu0 %1411, %v890_v3  }
 0x69a   :  { %v881_v4 = vpop.permute.xlu1 %880  ;;  %v884_v5 = vpop.permute.xlu0 %883 }
 0x69b   :  { %1368 = vmatprep.subr.mxu1 %v884_v5 }
 0x69c   :  { %1369 = vmatpush3.msra.mxu1 %v884_v5 }
 0x69d   :  { %1370 = vmatprep.subr.mxu1 %v881_v4 }
 0x69e   :  { %v875_v6 = vpop.permute.xlu1 %874  ;;  %1371 = vmatpush3.msra.mxu1 %v881_v4  ;;  %v878_v8 = vpop.permute.xlu0 %877 }
 0x69f   :  { %1372 = vmatprep.subr.mxu1 %v878_v8 }
 0x6a0   :  { %1373 = vmatpush3.msra.mxu1 %v878_v8 }
 0x6a1   :  { %1374 = vmatprep.subr.mxu1 %v875_v6 }
 0x6a2   :  { %1375 = vmatpush3.msra.mxu1 %v875_v6  ;;  %v872_v9 = vpop.permute.xlu0 %871  ;;  %v869_v10 = vpop.permute.xlu1 %868 }
 0x6a3   :  { %1376 = vmatprep.subr.mxu1 %v872_v9 }
 0x6a4   :  { %1377 = vmatpush3.msra.mxu1 %v872_v9 }
 0x6a5   :  { %1378 = vmatprep.subr.mxu1 %v869_v10 }
 0x6a6   :  { %1379 = vmatpush3.msra.mxu1 %v869_v10  ;;  %v866_v11 = vpop.permute.xlu0 %865 }
 0x6a7   :  { %1380 = vmatprep.subr.mxu1 %v866_v11 }
 0x6a8   :  { %1381 = vmatpush3.msra.mxu1 %v866_v11 }
 0x6a9   :  { %1382 = vmatprep.subr.mxu1 %v863_v60 }
 0x6aa   :  { %1383 = vmatpush3.msra.mxu1 %v863_v60 }
 0x6ab   :  { %1385 = vmatmul.mubr.msk.f32.vlgmr.msra.gmra.mxu1 %vm464_vm12, %v887_v12 }
 0x6ac   :  { %1387 = vmatprep.mubr.msk.f32.mxu1 %vm464_vm12, %v888_v13 }
 0x6af   :  { %1388 = vmatmul.mubr.msk.f32.gmra.mxu1 %vm464_vm12, %v889_v14  ;;  %v912_v15 = vpop.permute.xlu1 %911 }
 0x6b3   :  { %v907_v17 = vpop.permute.xlu0 %906  ;;  %v902_v21 = vpop.permute.xlu1 %901 }
 0x6b7   :  { %v897_v26 = vpop.permute.xlu0 %896  ;;  %v1020_v32 = vpop.permute.xlu1 %1019 }
 0x76b   :  { %v1386_v16 = vpop.f32.mrf.mxu1 }
 0x76c   :  { %v998_v23 = vadd.f32 %v1386_v16, %v902_v21 }
 0x76d   :  { %v992_v18 = vpop.f32.mrf.mxu1 }
 0x76e   :  { %v993_v27 = vadd.f32 %v992_v18, %v897_v26  ;;  %v1012_v29 = vmax.f32 %v998_v23, 0.0 }
 0x76f   :  { %v1389_v19 = vpop.f32.mrf.mxu1 }
 0x770   :  { %v1008_v20 = vadd.f32 %v1389_v19, %v912_v15  ;;  %v1011_v30 = vmax.f32 %v993_v27, 0.0 }
 0x771   :  { %v1002_v22 = vpop.f32.mrf.mxu1 }
 0x772   :  { %v1014_v24 = vmax.f32 %v1008_v20, 0.0  ;;  %v1003_v25 = vadd.f32 %v1002_v22, %v907_v17 }
 0x774   :  { %v1013_v28 = vmax.f32 %v1003_v25, 0.0  ;;  %1391 = vmatpush3.msra.mxu0 %v1014_v24 }
 0x775   :  { %1392 = vmatprep.subr.mxu0 %v1415_v7 }
 0x776   :  { %1393 = vmatpush3.msra.mxu0 %v1013_v28 }
 0x777   :  { %1394 = vmatprep.subr.mxu0 %v1415_v7 }
 0x778   :  { %1395 = vmatpush3.msra.mxu0 %v1012_v29 }
 0x779   :  { %1396 = vmatprep.subr.mxu0 %v1415_v7 }
 0x77a   :  { %1397 = vmatpush3.msra.mxu0 %v1011_v30 }
 0x77b   :  { %1399 = vmatmul.mubr.msk.f32.vlgmr.msra.gmra.mxu0 %vm715_vm13, %v1015_v31 }
 0x83b   :  { %v1091_v33 = vpop.f32.mrf.mxu0 }
 0x83c   :  { %v1092_v34 = vadd.f32 %v1091_v33, %v1020_v32 }
 0x83d   :  { %v1400_v35 = vpop.f32.mrf.mxu0 }
 0x83e   :  { %1096 = vst.msk [vmem:[%s1879_s17] sm:$0xf] %vm1095_vm14, %v1092_v34 }

</bundles_post_ra>
